<compile_context>
chip_gen: v5e
topology: v5e:2x2
jax: 0.10.0
libtpu: 0.0.40
codegen_flags: <defaults>
</compile_context>

<pallas_src>
import jax
import jax.numpy as jnp
from jax.experimental import pallas as pl
from jax.experimental.pallas import tpu as pltpu


def hnecv_kernel(x_ref, w1_ref, b1_ref, w2_ref, b2_ref,
                 wh_ref, bh_ref,
                 wd1_ref, bd1_ref, wd2_ref, bd2_ref, wo_ref, bo_ref,
                 prior_t_ref, p2_ref, n1_ref, n2_ref,
                 xrec_ref, terms_ref, q_ref):
    f32 = jnp.float32
    z_dim = prior_t_ref.shape[0]
    x = x_ref[...]

    # ---- encoder ----
    h1 = jnp.maximum(jnp.dot(x, w1_ref[...], preferred_element_type=f32) + b1_ref[...], 0.0)
    h2 = jnp.maximum(jnp.dot(h1, w2_ref[...], preferred_element_type=f32) + b2_ref[...], 0.0)

    # Fused Ex|En|He heads: one (tile_n, h2) x (h2, 3*z) MXU push, then lane slices.
    heads = jnp.dot(h2, wh_ref[...], preferred_element_type=f32) + bh_ref[...]
    ex = heads[:, :z_dim]
    en = heads[:, z_dim:2 * z_dim]
    he = heads[:, 2 * z_dim:]

    # ---- reparameterize ----
    n1 = n1_ref[...]
    n2 = n2_ref[...]
    z = ex + n1 * en + n1 * n2 * he
    enn = n1 * he + en

    # ---- decoder ----
    h3 = jnp.maximum(jnp.dot(z, wd1_ref[...], preferred_element_type=f32) + bd1_ref[...], 0.0)
    h4 = jnp.maximum(jnp.dot(h3, wd2_ref[...], preferred_element_type=f32) + bd2_ref[...], 0.0)
    xrec_ref[...] = jnp.dot(h4, wo_ref[...], preferred_element_type=f32) + bo_ref[...]

    # ---- elementwise terms, packed into one lane-dense output slab ----
    en2 = en * en
    terms_ref[...] = jnp.concatenate(
        [en2,                      # one_term  = En^2
         ex * ex,                  # two_term  = Ex^2
         jnp.log(1e-8 + en2)],     # three_term = log(eps + En^2)
        axis=1)

    # ---- cloud membership q ----
    prior_t = prior_t_ref[...]                                  # (Z, C)
    z2 = jnp.sum(z * z, axis=1, keepdims=True)                  # (N, 1)
    zp = jnp.dot(z, prior_t, preferred_element_type=f32)        # (N, C)
    dist2 = jnp.maximum(z2 + p2_ref[...] - 2.0 * zp, 0.0)       # sum_d (z - prior)^2 >= 0
    enn2 = jnp.sum(enn * enn, axis=1, keepdims=True)            # (N, 1)
    t = 1.0
    e = -(t + dist2) / (t + 2.0 * enn2)
    e = e - jnp.max(e, axis=1, keepdims=True)                   # stabilization (cancels below)
    q = jnp.exp(e)
    q_ref[...] = q * pl.reciprocal(jnp.sum(q, axis=1, keepdims=True), approx=True)


def _round_up(x, m):
    return (x + m - 1) // m * m


def hnecv_forward(x, params, noise1, noise2, *, tile_n=256):
    n, d_in = x.shape
    h1_dim = params["w1"].shape[1]
    h2_dim = params["w2"].shape[1]
    z_dim = params["wex"].shape[1]
    class_num = params["prior_t"].shape[1]

    # Wrapper-side packing: fuse the three z-heads; hoist the prior-norm constant.
    w_heads = jnp.concatenate([params["wex"], params["wen"], params["whe"]], axis=1)
    b_heads = jnp.concatenate([params["bex"], params["ben"], params["bhe"]], axis=1)
    prior_t = params["prior_t"]
    p2 = jnp.sum(prior_t * prior_t, axis=0, keepdims=True)       # (1, C)

    # Pad batch to a sublane-aligned multiple of the row tile.
    tile_n = min(tile_n, _round_up(max(n, 8), 8))
    n_pad = _round_up(n, tile_n)
    if n_pad != n:
        pad = ((0, n_pad - n), (0, 0))
        x = jnp.pad(x, pad)
        noise1 = jnp.pad(noise1, pad)
        noise2 = jnp.pad(noise2, pad)

    grid = (n_pad // tile_n,)

    def row_spec(d):
        return pl.BlockSpec((tile_n, d), lambda i: (i, 0))

    def const_spec(shape):
        return pl.BlockSpec(tuple(shape), lambda i: (0, 0))

    weights = (
        params["w1"], params["b1"], params["w2"], params["b2"],
        w_heads, b_heads,
        params["wd1"], params["bd1"], params["wd2"], params["bd2"],
        params["wo"], params["bo"],
        prior_t, p2,
    )
    args = (x,) + weights + (noise1, noise2)

    in_specs = ([row_spec(d_in)]
                + [const_spec(w.shape) for w in weights]
                + [row_spec(z_dim), row_spec(z_dim)])

    out_shape = (
        jax.ShapeDtypeStruct((n_pad, d_in), jnp.float32),          # x_reconst
        jax.ShapeDtypeStruct((n_pad, 3 * z_dim), jnp.float32),     # packed one|two|three
        jax.ShapeDtypeStruct((n_pad, class_num), jnp.float32),     # q
    )
    out_specs = (row_spec(d_in), row_spec(3 * z_dim), row_spec(class_num))

    flops = 2 * n_pad * (d_in * h1_dim + h1_dim * h2_dim + 3 * h2_dim * z_dim
                         + z_dim * h2_dim + h2_dim * h1_dim + h1_dim * d_in
                         + z_dim * class_num)
    bytes_accessed = 4 * (x.size + noise1.size + noise2.size
                          + sum(int(w.size) for w in weights)
                          + n_pad * (d_in + 3 * z_dim + class_num))
    cost = pl.CostEstimate(flops=flops,
                           transcendentals=n_pad * (z_dim + 2 * class_num),
                           bytes_accessed=bytes_accessed)

    xrec, terms, q = pl.pallas_call(
        hnecv_kernel,
        out_shape=out_shape,
        grid=grid,
        in_specs=in_specs,
        out_specs=out_specs,
        compiler_params=pltpu.CompilerParams(
            dimension_semantics=("parallel",),
            vmem_limit_bytes=64 * 1024 * 1024),
        cost_estimate=cost,
    )(*args)

    xrec = xrec[:n]
    terms = terms[:n]
    q = q[:n]
    one_term = terms[:, :z_dim]
    two_term = terms[:, z_dim:2 * z_dim]
    three_term = terms[:, 2 * z_dim:]
    return xrec, one_term, two_term, three_term, q


def init_params(key, d_in, h1_dim, h2_dim, z_dim, class_num):
    keys = jax.random.split(key, 17)

    def linear(kw, kb, fan_in, fan_out):
        bound = 1.0 / jnp.sqrt(jnp.float32(fan_in))
        w = jax.random.uniform(kw, (fan_in, fan_out), jnp.float32, -bound, bound)
        b = jax.random.uniform(kb, (1, fan_out), jnp.float32, -bound, bound)
        return w, b

    params = {}
    params["w1"], params["b1"] = linear(keys[0], keys[1], d_in, h1_dim)
    params["w2"], params["b2"] = linear(keys[2], keys[3], h1_dim, h2_dim)
    params["wex"], params["bex"] = linear(keys[4], keys[5], h2_dim, z_dim)
    params["wen"], params["ben"] = linear(keys[6], keys[7], h2_dim, z_dim)
    params["whe"], params["bhe"] = linear(keys[8], keys[9], h2_dim, z_dim)
    params["wd1"], params["bd1"] = linear(keys[10], keys[11], z_dim, h2_dim)
    params["wd2"], params["bd2"] = linear(keys[12], keys[13], h2_dim, h1_dim)
    params["wo"], params["bo"] = linear(keys[14], keys[15], h1_dim, d_in)
    # priorEx: xavier-normal init, stored transposed as (z_dim, class_num)
    xavier_std = jnp.sqrt(2.0 / (class_num + z_dim))
    params["prior_t"] = xavier_std * jax.random.normal(keys[16], (z_dim, class_num), jnp.float32)
    return params


def hnecv_reference(x, params, noise1, noise2):
    """Pure-JAX reference mirroring the PyTorch forward (for validation)."""
    relu = lambda v: jnp.maximum(v, 0.0)
    h1 = relu(x @ params["w1"] + params["b1"])
    h2 = relu(h1 @ params["w2"] + params["b2"])
    ex = h2 @ params["wex"] + params["bex"]
    en = h2 @ params["wen"] + params["ben"]
    he = h2 @ params["whe"] + params["bhe"]
    z = ex + noise1 * en + noise1 * noise2 * he
    enn = noise1 * he + en
    h3 = relu(z @ params["wd1"] + params["bd1"])
    h4 = relu(h3 @ params["wd2"] + params["bd2"])
    xrec = h4 @ params["wo"] + params["bo"]
    one_term = en ** 2
    two_term = ex ** 2
    three_term = jnp.log(1e-8 + en ** 2)
    prior = params["prior_t"].T                                     # (C, Z)
    dist2 = jnp.sum((z[:, None, :] - prior[None, :, :]) ** 2, axis=2)
    enn2 = jnp.sum(enn ** 2, axis=1, keepdims=True)
    t = 1.0
    q = jnp.exp(-(t + dist2) / (t + 2.0 * enn2))
    q = q / jnp.sum(q, axis=1, keepdims=True)
    return xrec, one_term, two_term, three_term, q


if __name__ == "__main__":
    N, D_IN, H1, H2, Z, C = 8, 32, 32, 32, 16, 4

    key = jax.random.PRNGKey(0)
    k_param, k_x, k_n1, k_n2 = jax.random.split(key, 4)

    params = init_params(k_param, D_IN, H1, H2, Z, C)
    x = jax.random.normal(k_x, (N, D_IN), jnp.float32)
    noise1 = jax.random.normal(k_n1, (N, Z), jnp.float32)
    noise2 = jax.random.normal(k_n2, (N, Z), jnp.float32)

    outs = jax.block_until_ready(hnecv_forward(x, params, noise1, noise2))
    x_reconst, one_term, two_term, three_term, q = outs

    assert x_reconst.shape == (N, D_IN)
    assert one_term.shape == (N, Z) and two_term.shape == (N, Z) and three_term.shape == (N, Z)
    assert q.shape == (N, C)

    refs = hnecv_reference(x, params, noise1, noise2)
    names = ("x_reconst", "one_term", "two_term", "three_term", "q")
    for name, got, ref in zip(names, outs, refs):
        assert bool(jnp.all(jnp.isfinite(got))), f"non-finite values in {name}"
        assert bool(jnp.allclose(got, ref, rtol=2e-2, atol=2e-2)), f"mismatch in {name}"

    print("KERNEL_OK")
</pallas_src>

<mosaic_0001>
module attributes {stable_mosaic.version = 11 : i64} {
  func.func @hnecv_kernel(%arg0: i32, %arg1: memref<8x32xf32, #tpu.memory_space<vmem>>, %arg2: memref<32x32xf32, #tpu.memory_space<vmem>>, %arg3: memref<1x32xf32, #tpu.memory_space<vmem>>, %arg4: memref<32x32xf32, #tpu.memory_space<vmem>>, %arg5: memref<1x32xf32, #tpu.memory_space<vmem>>, %arg6: memref<32x48xf32, #tpu.memory_space<vmem>>, %arg7: memref<1x48xf32, #tpu.memory_space<vmem>>, %arg8: memref<16x32xf32, #tpu.memory_space<vmem>>, %arg9: memref<1x32xf32, #tpu.memory_space<vmem>>, %arg10: memref<32x32xf32, #tpu.memory_space<vmem>>, %arg11: memref<1x32xf32, #tpu.memory_space<vmem>>, %arg12: memref<32x32xf32, #tpu.memory_space<vmem>>, %arg13: memref<1x32xf32, #tpu.memory_space<vmem>>, %arg14: memref<16x4xf32, #tpu.memory_space<vmem>>, %arg15: memref<1x4xf32, #tpu.memory_space<vmem>>, %arg16: memref<8x16xf32, #tpu.memory_space<vmem>>, %arg17: memref<8x16xf32, #tpu.memory_space<vmem>>, %arg18: memref<8x32xf32, #tpu.memory_space<vmem>>, %arg19: memref<8x48xf32, #tpu.memory_space<vmem>>, %arg20: memref<8x4xf32, #tpu.memory_space<vmem>>) attributes {dimension_semantics = [#tpu.dimension_semantics<parallel>], iteration_bounds = array<i64: 1>, scalar_prefetch = 0 : i64, scratch_operands = 0 : i64, tpu.core_type = #tpu.core_type<tc>, window_params = [{transform_indices = @transform_0, window_bounds = array<i64: 8, 32>}, {pipeline_mode = #tpu.pipeline_mode<synchronous>, transform_indices = @transform_1, window_bounds = array<i64: 32, 32>}, {pipeline_mode = #tpu.pipeline_mode<synchronous>, transform_indices = @transform_2, window_bounds = array<i64: 1, 32>}, {pipeline_mode = #tpu.pipeline_mode<synchronous>, transform_indices = @transform_3, window_bounds = array<i64: 32, 32>}, {pipeline_mode = #tpu.pipeline_mode<synchronous>, transform_indices = @transform_4, window_bounds = array<i64: 1, 32>}, {pipeline_mode = #tpu.pipeline_mode<synchronous>, transform_indices = @transform_5, window_bounds = array<i64: 32, 48>}, {pipeline_mode = #tpu.pipeline_mode<synchronous>, transform_indices = @transform_6, window_bounds = array<i64: 1, 48>}, {pipeline_mode = #tpu.pipeline_mode<synchronous>, transform_indices = @transform_7, window_bounds = array<i64: 16, 32>}, {pipeline_mode = #tpu.pipeline_mode<synchronous>, transform_indices = @transform_8, window_bounds = array<i64: 1, 32>}, {pipeline_mode = #tpu.pipeline_mode<synchronous>, transform_indices = @transform_9, window_bounds = array<i64: 32, 32>}, {pipeline_mode = #tpu.pipeline_mode<synchronous>, transform_indices = @transform_10, window_bounds = array<i64: 1, 32>}, {pipeline_mode = #tpu.pipeline_mode<synchronous>, transform_indices = @transform_11, window_bounds = array<i64: 32, 32>}, {pipeline_mode = #tpu.pipeline_mode<synchronous>, transform_indices = @transform_12, window_bounds = array<i64: 1, 32>}, {pipeline_mode = #tpu.pipeline_mode<synchronous>, transform_indices = @transform_13, window_bounds = array<i64: 16, 4>}, {pipeline_mode = #tpu.pipeline_mode<synchronous>, transform_indices = @transform_14, window_bounds = array<i64: 1, 4>}, {transform_indices = @transform_15, window_bounds = array<i64: 8, 16>}, {transform_indices = @transform_16, window_bounds = array<i64: 8, 16>}, {transform_indices = @transform_17, window_bounds = array<i64: 8, 32>}, {transform_indices = @transform_18, window_bounds = array<i64: 8, 48>}, {transform_indices = @transform_19, window_bounds = array<i64: 8, 4>}]} {
    %c0 = arith.constant 0 : index
    %c0_0 = arith.constant 0 : index
    %0 = vector.load %arg1[%c0, %c0_0] : memref<8x32xf32, #tpu.memory_space<vmem>>, vector<8x32xf32>
    %c0_1 = arith.constant 0 : index
    %c0_2 = arith.constant 0 : index
    %1 = vector.load %arg2[%c0_1, %c0_2] : memref<32x32xf32, #tpu.memory_space<vmem>>, vector<32x32xf32>
    %cst = arith.constant dense<0.000000e+00> : vector<8x32xf32>
    %2 = tpu.matmul %0, %1, %cst {dimension_numbers = #tpu.dot_dimension_numbers<[1], [0], [0], [1], [0, 0, 1, 1], [], []>} : vector<8x32xf32>, vector<32x32xf32>, vector<8x32xf32> -> vector<8x32xf32>
    %c0_3 = arith.constant 0 : index
    %c0_4 = arith.constant 0 : index
    %3 = vector.load %arg3[%c0_3, %c0_4] : memref<1x32xf32, #tpu.memory_space<vmem>>, vector<1x32xf32>
    %4 = vector.broadcast %3 : vector<1x32xf32> to vector<8x32xf32>
    %5 = arith.addf %2, %4 : vector<8x32xf32>
    %cst_5 = arith.constant 0.000000e+00 : f32
    %6 = vector.broadcast %cst_5 : f32 to vector<8x32xf32>
    %7 = arith.maximumf %5, %6 : vector<8x32xf32>
    %c0_6 = arith.constant 0 : index
    %c0_7 = arith.constant 0 : index
    %8 = vector.load %arg4[%c0_6, %c0_7] : memref<32x32xf32, #tpu.memory_space<vmem>>, vector<32x32xf32>
    %cst_8 = arith.constant dense<0.000000e+00> : vector<8x32xf32>
    %9 = tpu.matmul %7, %8, %cst_8 {dimension_numbers = #tpu.dot_dimension_numbers<[1], [0], [0], [1], [0, 0, 1, 1], [], []>} : vector<8x32xf32>, vector<32x32xf32>, vector<8x32xf32> -> vector<8x32xf32>
    %c0_9 = arith.constant 0 : index
    %c0_10 = arith.constant 0 : index
    %10 = vector.load %arg5[%c0_9, %c0_10] : memref<1x32xf32, #tpu.memory_space<vmem>>, vector<1x32xf32>
    %11 = vector.broadcast %10 : vector<1x32xf32> to vector<8x32xf32>
    %12 = arith.addf %9, %11 : vector<8x32xf32>
    %cst_11 = arith.constant 0.000000e+00 : f32
    %13 = vector.broadcast %cst_11 : f32 to vector<8x32xf32>
    %14 = arith.maximumf %12, %13 : vector<8x32xf32>
    %c0_12 = arith.constant 0 : index
    %c0_13 = arith.constant 0 : index
    %15 = vector.load %arg6[%c0_12, %c0_13] : memref<32x48xf32, #tpu.memory_space<vmem>>, vector<32x48xf32>
    %cst_14 = arith.constant dense<0.000000e+00> : vector<8x48xf32>
    %16 = tpu.matmul %14, %15, %cst_14 {dimension_numbers = #tpu.dot_dimension_numbers<[1], [0], [0], [1], [0, 0, 1, 1], [], []>} : vector<8x32xf32>, vector<32x48xf32>, vector<8x48xf32> -> vector<8x48xf32>
    %c0_15 = arith.constant 0 : index
    %c0_16 = arith.constant 0 : index
    %17 = vector.load %arg7[%c0_15, %c0_16] : memref<1x48xf32, #tpu.memory_space<vmem>>, vector<1x48xf32>
    %18 = vector.broadcast %17 : vector<1x48xf32> to vector<8x48xf32>
    %19 = arith.addf %16, %18 : vector<8x48xf32>
    %20 = vector.extract_strided_slice %19 {offsets = [0, 0], sizes = [8, 16], strides = [1, 1]} : vector<8x48xf32> to vector<8x16xf32>
    %21 = vector.extract_strided_slice %19 {offsets = [0, 16], sizes = [8, 16], strides = [1, 1]} : vector<8x48xf32> to vector<8x16xf32>
    %22 = vector.extract_strided_slice %19 {offsets = [0, 32], sizes = [8, 16], strides = [1, 1]} : vector<8x48xf32> to vector<8x16xf32>
    %c0_17 = arith.constant 0 : index
    %c0_18 = arith.constant 0 : index
    %23 = vector.load %arg16[%c0_17, %c0_18] : memref<8x16xf32, #tpu.memory_space<vmem>>, vector<8x16xf32>
    %c0_19 = arith.constant 0 : index
    %c0_20 = arith.constant 0 : index
    %24 = vector.load %arg17[%c0_19, %c0_20] : memref<8x16xf32, #tpu.memory_space<vmem>>, vector<8x16xf32>
    %25 = arith.mulf %23, %21 : vector<8x16xf32>
    %26 = arith.addf %20, %25 : vector<8x16xf32>
    %27 = arith.mulf %23, %24 : vector<8x16xf32>
    %28 = arith.mulf %27, %22 : vector<8x16xf32>
    %29 = arith.addf %26, %28 : vector<8x16xf32>
    %30 = arith.mulf %23, %22 : vector<8x16xf32>
    %31 = arith.addf %30, %21 : vector<8x16xf32>
    %c0_21 = arith.constant 0 : index
    %c0_22 = arith.constant 0 : index
    %32 = vector.load %arg8[%c0_21, %c0_22] : memref<16x32xf32, #tpu.memory_space<vmem>>, vector<16x32xf32>
    %cst_23 = arith.constant dense<0.000000e+00> : vector<8x32xf32>
    %33 = tpu.matmul %29, %32, %cst_23 {dimension_numbers = #tpu.dot_dimension_numbers<[1], [0], [0], [1], [0, 0, 1, 1], [], []>} : vector<8x16xf32>, vector<16x32xf32>, vector<8x32xf32> -> vector<8x32xf32>
    %c0_24 = arith.constant 0 : index
    %c0_25 = arith.constant 0 : index
    %34 = vector.load %arg9[%c0_24, %c0_25] : memref<1x32xf32, #tpu.memory_space<vmem>>, vector<1x32xf32>
    %35 = vector.broadcast %34 : vector<1x32xf32> to vector<8x32xf32>
    %36 = arith.addf %33, %35 : vector<8x32xf32>
    %cst_26 = arith.constant 0.000000e+00 : f32
    %37 = vector.broadcast %cst_26 : f32 to vector<8x32xf32>
    %38 = arith.maximumf %36, %37 : vector<8x32xf32>
    %c0_27 = arith.constant 0 : index
    %c0_28 = arith.constant 0 : index
    %39 = vector.load %arg10[%c0_27, %c0_28] : memref<32x32xf32, #tpu.memory_space<vmem>>, vector<32x32xf32>
    %cst_29 = arith.constant dense<0.000000e+00> : vector<8x32xf32>
    %40 = tpu.matmul %38, %39, %cst_29 {dimension_numbers = #tpu.dot_dimension_numbers<[1], [0], [0], [1], [0, 0, 1, 1], [], []>} : vector<8x32xf32>, vector<32x32xf32>, vector<8x32xf32> -> vector<8x32xf32>
    %c0_30 = arith.constant 0 : index
    %c0_31 = arith.constant 0 : index
    %41 = vector.load %arg11[%c0_30, %c0_31] : memref<1x32xf32, #tpu.memory_space<vmem>>, vector<1x32xf32>
    %42 = vector.broadcast %41 : vector<1x32xf32> to vector<8x32xf32>
    %43 = arith.addf %40, %42 : vector<8x32xf32>
    %cst_32 = arith.constant 0.000000e+00 : f32
    %44 = vector.broadcast %cst_32 : f32 to vector<8x32xf32>
    %45 = arith.maximumf %43, %44 : vector<8x32xf32>
    %c0_33 = arith.constant 0 : index
    %c0_34 = arith.constant 0 : index
    %46 = vector.load %arg12[%c0_33, %c0_34] : memref<32x32xf32, #tpu.memory_space<vmem>>, vector<32x32xf32>
    %cst_35 = arith.constant dense<0.000000e+00> : vector<8x32xf32>
    %47 = tpu.matmul %45, %46, %cst_35 {dimension_numbers = #tpu.dot_dimension_numbers<[1], [0], [0], [1], [0, 0, 1, 1], [], []>} : vector<8x32xf32>, vector<32x32xf32>, vector<8x32xf32> -> vector<8x32xf32>
    %c0_36 = arith.constant 0 : index
    %c0_37 = arith.constant 0 : index
    %48 = vector.load %arg13[%c0_36, %c0_37] : memref<1x32xf32, #tpu.memory_space<vmem>>, vector<1x32xf32>
    %49 = vector.broadcast %48 : vector<1x32xf32> to vector<8x32xf32>
    %50 = arith.addf %47, %49 : vector<8x32xf32>
    %c0_38 = arith.constant 0 : index
    %c0_39 = arith.constant 0 : index
    %51 = vector.load %arg18[%c0_38, %c0_39] : memref<8x32xf32, #tpu.memory_space<vmem>>, vector<8x32xf32>
    tpu.vector_store %arg18[%c0_38, %c0_39], %50 {strides = array<i32>} : memref<8x32xf32, #tpu.memory_space<vmem>>, vector<8x32xf32>,
    %52 = arith.mulf %21, %21 : vector<8x16xf32>
    %53 = arith.mulf %20, %20 : vector<8x16xf32>
    %cst_40 = arith.constant 9.99999993E-9 : f32
    %54 = vector.broadcast %cst_40 : f32 to vector<8x16xf32>
    %55 = arith.addf %54, %52 : vector<8x16xf32>
    %56 = math.log %55 : vector<8x16xf32>
    %57 = tpu.concatenate %52, %53, %56 in 1 : vector<8x16xf32>, vector<8x16xf32>, vector<8x16xf32> -> vector<8x48xf32>
    %c0_41 = arith.constant 0 : index
    %c0_42 = arith.constant 0 : index
    %58 = vector.load %arg19[%c0_41, %c0_42] : memref<8x48xf32, #tpu.memory_space<vmem>>, vector<8x48xf32>
    tpu.vector_store %arg19[%c0_41, %c0_42], %57 {strides = array<i32>} : memref<8x48xf32, #tpu.memory_space<vmem>>, vector<8x48xf32>,
    %c0_43 = arith.constant 0 : index
    %c0_44 = arith.constant 0 : index
    %59 = vector.load %arg14[%c0_43, %c0_44] : memref<16x4xf32, #tpu.memory_space<vmem>>, vector<16x4xf32>
    %60 = arith.mulf %29, %29 : vector<8x16xf32>
    %cst_45 = arith.constant dense<0.000000e+00> : vector<8xf32>
    %61 = vector.multi_reduction <add>, %60, %cst_45 [1] : vector<8x16xf32> to vector<8xf32>
    %62 = vector.shape_cast %61 : vector<8xf32> to vector<8x1xf32>
    %cst_46 = arith.constant dense<0.000000e+00> : vector<8x4xf32>
    %63 = tpu.matmul %29, %59, %cst_46 {dimension_numbers = #tpu.dot_dimension_numbers<[1], [0], [0], [1], [0, 0, 1, 1], [], []>} : vector<8x16xf32>, vector<16x4xf32>, vector<8x4xf32> -> vector<8x4xf32>
    %c0_47 = arith.constant 0 : index
    %c0_48 = arith.constant 0 : index
    %64 = vector.load %arg15[%c0_47, %c0_48] : memref<1x4xf32, #tpu.memory_space<vmem>>, vector<1x4xf32>
    %65 = vector.broadcast %62 : vector<8x1xf32> to vector<8x4xf32>
    %66 = vector.broadcast %64 : vector<1x4xf32> to vector<8x4xf32>
    %67 = arith.addf %65, %66 : vector<8x4xf32>
    %cst_49 = arith.constant 2.000000e+00 : f32
    %68 = vector.broadcast %cst_49 : f32 to vector<8x4xf32>
    %69 = arith.mulf %68, %63 : vector<8x4xf32>
    %70 = arith.subf %67, %69 : vector<8x4xf32>
    %cst_50 = arith.constant 0.000000e+00 : f32
    %71 = vector.broadcast %cst_50 : f32 to vector<8x4xf32>
    %72 = arith.maximumf %70, %71 : vector<8x4xf32>
    %73 = arith.mulf %31, %31 : vector<8x16xf32>
    %cst_51 = arith.constant dense<0.000000e+00> : vector<8xf32>
    %74 = vector.multi_reduction <add>, %73, %cst_51 [1] : vector<8x16xf32> to vector<8xf32>
    %75 = vector.shape_cast %74 : vector<8xf32> to vector<8x1xf32>
    %cst_52 = arith.constant 1.000000e+00 : f32
    %76 = vector.broadcast %cst_52 : f32 to vector<8x4xf32>
    %77 = arith.addf %76, %72 : vector<8x4xf32>
    %cst_53 = arith.constant 0.000000e+00 : f32
    %78 = vector.broadcast %cst_53 : f32 to vector<8x4xf32>
    %79 = arith.subf %78, %77 : vector<8x4xf32>
    %cst_54 = arith.constant 2.000000e+00 : f32
    %80 = vector.broadcast %cst_54 : f32 to vector<8x1xf32>
    %81 = arith.mulf %80, %75 : vector<8x1xf32>
    %cst_55 = arith.constant 1.000000e+00 : f32
    %82 = vector.broadcast %cst_55 : f32 to vector<8x1xf32>
    %83 = arith.addf %82, %81 : vector<8x1xf32>
    %84 = vector.broadcast %83 : vector<8x1xf32> to vector<8x4xf32>
    %85 = arith.divf %79, %84 : vector<8x4xf32>
    %cst_56 = arith.constant dense<0xFF800000> : vector<8xf32>
    %86 = vector.multi_reduction <maximumf>, %85, %cst_56 [1] : vector<8x4xf32> to vector<8xf32>
    %87 = vector.shape_cast %86 : vector<8xf32> to vector<8x1xf32>
    %88 = vector.broadcast %87 : vector<8x1xf32> to vector<8x4xf32>
    %89 = arith.subf %85, %88 : vector<8x4xf32>
    %90 = math.exp %89 : vector<8x4xf32>
    %cst_57 = arith.constant dense<0.000000e+00> : vector<8xf32>
    %91 = vector.multi_reduction <add>, %90, %cst_57 [1] : vector<8x4xf32> to vector<8xf32>
    %92 = vector.shape_cast %91 : vector<8xf32> to vector<8x1xf32>
    %93 = tpu.reciprocal %92 {approx = true} : vector<8x1xf32> -> vector<8x1xf32>
    %94 = vector.broadcast %93 : vector<8x1xf32> to vector<8x4xf32>
    %95 = arith.mulf %90, %94 : vector<8x4xf32>
    %c0_58 = arith.constant 0 : index
    %c0_59 = arith.constant 0 : index
    %96 = vector.load %arg20[%c0_58, %c0_59] : memref<8x4xf32, #tpu.memory_space<vmem>>, vector<8x4xf32>
    tpu.vector_store %arg20[%c0_58, %c0_59], %95 {strides = array<i32>} : memref<8x4xf32, #tpu.memory_space<vmem>>, vector<8x4xf32>,
    return
  }
  func.func @transform_0(%arg0: i32) -> (i32, i32) {
    %c0_i32 = arith.constant 0 : i32
    %c0_i32_0 = arith.constant 0 : i32
    return %arg0, %c0_i32 : i32, i32
  }
  func.func @transform_1(%arg0: i32) -> (i32, i32) {
    %c0_i32 = arith.constant 0 : i32
    %c0_i32_0 = arith.constant 0 : i32
    %c0_i32_1 = arith.constant 0 : i32
    return %c0_i32, %c0_i32_0 : i32, i32
  }
  func.func @transform_2(%arg0: i32) -> (i32, i32) {
    %c0_i32 = arith.constant 0 : i32
    %c0_i32_0 = arith.constant 0 : i32
    %c0_i32_1 = arith.constant 0 : i32
    return %c0_i32, %c0_i32_0 : i32, i32
  }
  func.func @transform_3(%arg0: i32) -> (i32, i32) {
    %c0_i32 = arith.constant 0 : i32
    %c0_i32_0 = arith.constant 0 : i32
    %c0_i32_1 = arith.constant 0 : i32
    return %c0_i32, %c0_i32_0 : i32, i32
  }
  func.func @transform_4(%arg0: i32) -> (i32, i32) {
    %c0_i32 = arith.constant 0 : i32
    %c0_i32_0 = arith.constant 0 : i32
    %c0_i32_1 = arith.constant 0 : i32
    return %c0_i32, %c0_i32_0 : i32, i32
  }
  func.func @transform_5(%arg0: i32) -> (i32, i32) {
    %c0_i32 = arith.constant 0 : i32
    %c0_i32_0 = arith.constant 0 : i32
    %c0_i32_1 = arith.constant 0 : i32
    return %c0_i32, %c0_i32_0 : i32, i32
  }
  func.func @transform_6(%arg0: i32) -> (i32, i32) {
    %c0_i32 = arith.constant 0 : i32
    %c0_i32_0 = arith.constant 0 : i32
    %c0_i32_1 = arith.constant 0 : i32
    return %c0_i32, %c0_i32_0 : i32, i32
  }
  func.func @transform_7(%arg0: i32) -> (i32, i32) {
    %c0_i32 = arith.constant 0 : i32
    %c0_i32_0 = arith.constant 0 : i32
    %c0_i32_1 = arith.constant 0 : i32
    return %c0_i32, %c0_i32_0 : i32, i32
  }
  func.func @transform_8(%arg0: i32) -> (i32, i32) {
    %c0_i32 = arith.constant 0 : i32
    %c0_i32_0 = arith.constant 0 : i32
    %c0_i32_1 = arith.constant 0 : i32
    return %c0_i32, %c0_i32_0 : i32, i32
  }
  func.func @transform_9(%arg0: i32) -> (i32, i32) {
    %c0_i32 = arith.constant 0 : i32
    %c0_i32_0 = arith.constant 0 : i32
    %c0_i32_1 = arith.constant 0 : i32
    return %c0_i32, %c0_i32_0 : i32, i32
  }
  func.func @transform_10(%arg0: i32) -> (i32, i32) {
    %c0_i32 = arith.constant 0 : i32
    %c0_i32_0 = arith.constant 0 : i32
    %c0_i32_1 = arith.constant 0 : i32
    return %c0_i32, %c0_i32_0 : i32, i32
  }
  func.func @transform_11(%arg0: i32) -> (i32, i32) {
    %c0_i32 = arith.constant 0 : i32
    %c0_i32_0 = arith.constant 0 : i32
    %c0_i32_1 = arith.constant 0 : i32
    return %c0_i32, %c0_i32_0 : i32, i32
  }
  func.func @transform_12(%arg0: i32) -> (i32, i32) {
    %c0_i32 = arith.constant 0 : i32
    %c0_i32_0 = arith.constant 0 : i32
    %c0_i32_1 = arith.constant 0 : i32
    return %c0_i32, %c0_i32_0 : i32, i32
  }
  func.func @transform_13(%arg0: i32) -> (i32, i32) {
    %c0_i32 = arith.constant 0 : i32
    %c0_i32_0 = arith.constant 0 : i32
    %c0_i32_1 = arith.constant 0 : i32
    return %c0_i32, %c0_i32_0 : i32, i32
  }
  func.func @transform_14(%arg0: i32) -> (i32, i32) {
    %c0_i32 = arith.constant 0 : i32
    %c0_i32_0 = arith.constant 0 : i32
    %c0_i32_1 = arith.constant 0 : i32
    return %c0_i32, %c0_i32_0 : i32, i32
  }
  func.func @transform_15(%arg0: i32) -> (i32, i32) {
    %c0_i32 = arith.constant 0 : i32
    %c0_i32_0 = arith.constant 0 : i32
    return %arg0, %c0_i32 : i32, i32
  }
  func.func @transform_16(%arg0: i32) -> (i32, i32) {
    %c0_i32 = arith.constant 0 : i32
    %c0_i32_0 = arith.constant 0 : i32
    return %arg0, %c0_i32 : i32, i32
  }
  func.func @transform_17(%arg0: i32) -> (i32, i32) {
    %c0_i32 = arith.constant 0 : i32
    %c0_i32_0 = arith.constant 0 : i32
    return %arg0, %c0_i32 : i32, i32
  }
  func.func @transform_18(%arg0: i32) -> (i32, i32) {
    %c0_i32 = arith.constant 0 : i32
    %c0_i32_0 = arith.constant 0 : i32
    return %arg0, %c0_i32 : i32, i32
  }
  func.func @transform_19(%arg0: i32) -> (i32, i32) {
    %c0_i32 = arith.constant 0 : i32
    %c0_i32_0 = arith.constant 0 : i32
    return %arg0, %c0_i32 : i32, i32
  }
}

</mosaic_0001>

<bundles_post_ra>
// kernel: tpu_custom_call.1
= control target key start
LH: loop header
LB: loop body
LE: loop exit
PB: predicated region body
PF: predicated region fallthrough
CT: control target
= control target key end

     0   :  { %s1176_s0 = inlined_call_operand.vmem [shape: f32[8,32], index: 0, kind: input, shape index: {}]   ;;  %s1177_s1 = inlined_call_operand.hbm [shape: f32[32,32], index: 1, kind: input, shape index: {}]   ;;  %s1178_s2 = inlined_call_operand.hbm [shape: f32[1,32], index: 2, kind: input, shape index: {}]   ;;  %s1179_s3 = inlined_call_operand.hbm [shape: f32[32,32], index: 3, kind: input, shape index: {}]   ;;  %s1180_s4 = inlined_call_operand.hbm [shape: f32[1,32], index: 4, kind: input, shape index: {}]   ;;  %s1181_s5 = inlined_call_operand.hbm [shape: f32[32,48], index: 5, kind: input, shape index: {}]   ;;  %s1182_s6 = inlined_call_operand.hbm [shape: f32[1,48], index: 6, kind: input, shape index: {}]   ;;  %s1183_s7 = inlined_call_operand.vmem [shape: f32[16,32], index: 7, kind: input, shape index: {}]   ;;  %s1184_s8 = inlined_call_operand.hbm [shape: f32[1,32], index: 8, kind: input, shape index: {}]   ;;  %s1185_s9 = inlined_call_operand.hbm [shape: f32[32,32], index: 9, kind: input, shape index: {}]   ;;  %s1186_s10 = inlined_call_operand.hbm [shape: f32[1,32], index: 10, kind: input, shape index: {}]   ;;  %s1187_s11 = inlined_call_operand.hbm [shape: f32[32,32], index: 11, kind: input, shape index: {}]   ;;  %s1188_s12 = inlined_call_operand.hbm [shape: f32[1,32], index: 12, kind: input, shape index: {}]   ;;  %s1189_s13 = inlined_call_operand.vmem [shape: f32[16,4], index: 13, kind: input, shape index: {}]   ;;  %s1190_s14 = inlined_call_operand.vmem [shape: f32[1,4], index: 14, kind: input, shape index: {}]   ;;  %s1191_s15 = inlined_call_operand.vmem [shape: f32[8,16], index: 15, kind: input, shape index: {}]   ;;  %s1192_s16 = inlined_call_operand.hbm [shape: f32[8,16], index: 16, kind: input, shape index: {}]   ;;  %s1193_s17 = inlined_call_operand.hbm [shape: f32[8,32], index: 17, kind: output, shape index: {0}]   ;;  %s1194_s18 = inlined_call_operand.hbm [shape: f32[8,48], index: 18, kind: output, shape index: {1}]   ;;  %s1195_s19 = inlined_call_operand.vmem [shape: f32[8,4], index: 19, kind: output, shape index: {2}]  }
   0x1   :  { %1196 = sst [smem:[#allocation34_spill]] %s1176_s0 }
   0x2   :  { %1197 = sst [smem:[#allocation35_spill]] %s1177_s1 }
   0x3   :  { %1198 = sst [smem:[#allocation36_spill]] %s1178_s2 }
   0x4   :  { %1199 = sst [smem:[#allocation37_spill]] %s1179_s3 }
   0x5   :  { %25 = vsyncpa [#allocation3], 0 }
   0x6   :  { %26 = vsyncpa [#allocation6], 0 }
   0x7   :  { %27 = vsyncpa [#allocation9], 0 }
   0x8   :  { %28 = vsyncpa [#allocation12], 0 }
   0x9   :  { %29 = vsyncpa [#allocation15], 0 }
   0xa   :  { %30 = vsyncpa [#allocation18], 0 }
   0xb   :  { %31 = vsyncpa [#allocation21], 0 }
   0xc   :  { %32 = vsyncpa [#allocation4], 0  ;;  %s1200_s20 = sld [smem:[#allocation36_spill]] }
  0x12   :  { %s54_s21 = sshll.u32 %s1200_s20, 4  ;;  %s55_s21 = int_to_ptr.hbm [resolvable:$true] %s54_s21 }
  0x13   :  { %33 = vsyncpa [#allocation24], 0  ;;  %s969_s1 = smov [#allocation5]   ;;  %s78_s24 = sshll.u32 %s1180_s4, 4  ;;  %s79_s24 = int_to_ptr.hbm [resolvable:$true] %s78_s24 }
  0x14   :  { %s56_s22 = sshll.u32 %s969_s1, 4  ;;  %s970_s25 = smov [#allocation8]   ;;  %s57_s22 = int_to_ptr.vmem [resolvable:$true] %s56_s22 }
  0x15   :  { %59 = dma.hbm_to_vmem [thread:$0]  %s55_s21, 16, %s57_s22, [#allocation6]  }
  0x16   :  { %s80_s3 = sshll.u32 %s970_s25, 4  ;;  %s102_s28 = sshll.u32 %s1182_s6, 4  ;;  %s81_s3 = int_to_ptr.vmem [resolvable:$true] %s80_s3  ;;  %s103_s28 = int_to_ptr.hbm [resolvable:$true] %s102_s28 }
  0x17   :  { %83 = dma.hbm_to_vmem [thread:$0]  %s79_s24, 16, %s81_s3, [#allocation9]  }
  0x18   :  { %s971_s29 = smov [#allocation11]   ;;  %s125_s1 = sshll.u32 %s1185_s9, 4  ;;  %s126_s1 = int_to_ptr.hbm [resolvable:$true] %s125_s1 }
  0x19   :  { %s104_s0 = sshll.u32 %s971_s29, 4  ;;  %s972_s4 = smov [#allocation14]   ;;  %s105_s0 = int_to_ptr.vmem [resolvable:$true] %s104_s0 }
  0x1a   :  { %107 = dma.hbm_to_vmem [thread:$0]  %s103_s28, 16, %s105_s0, [#allocation12]  }
  0x1b   :  { %s127_s21 = sshll.u32 %s972_s4, 4  ;;  %s149_s23 = sshll.u32 %s1187_s11, 4  ;;  %s128_s21 = int_to_ptr.vmem [resolvable:$true] %s127_s21  ;;  %s150_s23 = int_to_ptr.hbm [resolvable:$true] %s149_s23 }
  0x1c   :  { %s973_s6 = smov 128   ;;  %s974_s25 = smov 8  }
  0x1d   :  { %133 = dma.hbm_to_vmem [thread:$0]  %s126_s1, 512, %s128_s21, [#allocation15], %s973_s6, %s973_s6, %s974_s25  }
  0x1e   :  { %s1201_s26 = sld [smem:[#allocation35_spill]]  ;;  %s975_s29 = smov [#allocation17]  }
  0x1f   :  { %s151_s30 = sshll.u32 %s975_s29, 4  ;;  %s976_s9 = smov [#allocation2]   ;;  %s152_s30 = int_to_ptr.vmem [resolvable:$true] %s151_s30 }
  0x20   :  { %157 = dma.hbm_to_vmem [thread:$0]  %s150_s23, 512, %s152_s30, [#allocation18], %s973_s6, %s973_s6, %s974_s25  }
  0x21   :  { %s42_s28 = sshll.u32 %s976_s9, 4  ;;  %s1202_s4 = sld [smem:[#allocation37_spill]]  ;;  %s43_s28 = int_to_ptr.vmem [resolvable:$true] %s42_s28 }
  0x22   :  { %s88_s21 = sshll.u32 %s1181_s5, 4  ;;  %s977_s2 = smov [#allocation7]   ;;  %s89_s21 = int_to_ptr.hbm [resolvable:$true] %s88_s21 }
  0x23   :  { %s66_s24 = sshll.u32 %s977_s2, 4  ;;  %s978_s3 = smov [#allocation10]   ;;  %s67_s24 = int_to_ptr.vmem [resolvable:$true] %s66_s24 }
  0x24   :  { %s40_s27 = sshll.u32 %s1201_s26, 4  ;;  %s90_s23 = sshll.u32 %s978_s3, 4  ;;  %s41_s27 = int_to_ptr.hbm [resolvable:$true] %s40_s27  ;;  %s91_s23 = int_to_ptr.vmem [resolvable:$true] %s90_s23 }
  0x25   :  { %48 = dma.hbm_to_vmem [thread:$0]  %s41_s27, 512, %s43_s28, [#allocation3], %s973_s6, %s973_s6, %s974_s25  }
  0x26   :  { %s115_s30 = sshll.u32 %s1184_s8, 4  ;;  %s139_s28 = sshll.u32 %s1186_s10, 4  ;;  %s116_s30 = int_to_ptr.hbm [resolvable:$true] %s115_s30  ;;  %s140_s28 = int_to_ptr.hbm [resolvable:$true] %s139_s28 }
  0x27   :  { %s64_s11 = sshll.u32 %s1202_s4, 4  ;;  %s979_s0 = smov [#allocation13]   ;;  %s65_s11 = int_to_ptr.hbm [resolvable:$true] %s64_s11 }
  0x28   :  { %72 = dma.hbm_to_vmem [thread:$0]  %s65_s11, 512, %s67_s24, [#allocation6], %s973_s6, %s973_s6, %s974_s25  }
  0x29   :  { %96 = dma.hbm_to_vmem [thread:$0]  %s89_s21, 512, %s91_s23, [#allocation9], %s973_s6, %s973_s6, %s974_s25  }
  0x2a   :  { %s117_s5 = sshll.u32 %s979_s0, 4  ;;  %s980_s20 = smov [#allocation16]   ;;  %s118_s5 = int_to_ptr.vmem [resolvable:$true] %s117_s5 }
  0x2b   :  { %120 = dma.hbm_to_vmem [thread:$0]  %s116_s30, 16, %s118_s5, [#allocation12]  }
  0x2c   :  { %s141_s4 = sshll.u32 %s980_s20, 4  ;;  %s163_s1 = sshll.u32 %s1188_s12, 4  ;;  %s142_s4 = int_to_ptr.vmem [resolvable:$true] %s141_s4  ;;  %s164_s1 = int_to_ptr.hbm [resolvable:$true] %s163_s1 }
  0x2d   :  { %144 = dma.hbm_to_vmem [thread:$0]  %s140_s28, 16, %s142_s4, [#allocation15]  }
  0x2e   :  { %s180_s25 = sshll.u32 %s1192_s16, 4  ;;  %s981_s21 = smov [#allocation19]   ;;  %s181_s25 = int_to_ptr.hbm [resolvable:$true] %s180_s25 }
  0x2f   :  { %s165_s10 = sshll.u32 %s981_s21, 4  ;;  %s982_s2 = smov [#allocation20]   ;;  %s166_s10 = int_to_ptr.vmem [resolvable:$true] %s165_s10 }
  0x30   :  { %168 = dma.hbm_to_vmem [thread:$0]  %s164_s1, 16, %s166_s10, [#allocation18]  }
  0x31   :  { %s182_s24 = sshll.u32 %s982_s2, 4  ;;  %s183_s24 = int_to_ptr.vmem [resolvable:$true] %s182_s24 }
  0x32   :  { %185 = dma.hbm_to_vmem [thread:$0]  %s181_s25, 128, %s183_s24, [#allocation21]  }
  0x33   :  { %951 = dma.done.wait [#allocation3], 512  }
  0x34   :  { %952 = vsyncadd [#allocation3], 4294966784 }
  0x35   :  { %953 = dma.done.wait [#allocation6], 528  }
  0x36   :  { %954 = vsyncadd [#allocation6], 4294966768 }
  0x37   :  { %955 = dma.done.wait [#allocation9], 528  }
  0x38   :  { %956 = vsyncadd [#allocation9], 4294966768 }
  0x39   :  { %957 = dma.done.wait [#allocation12], 32  }
  0x3a   :  { %958 = vsyncadd [#allocation12], 4294967264 }
  0x3b   :  { %959 = dma.done.wait [#allocation15], 528  }
  0x3c   :  { %960 = vsyncadd [#allocation15], 4294966768 }
  0x3d   :  { %961 = dma.done.wait [#allocation18], 528  }
  0x3e   :  { %962 = vsyncadd [#allocation18], 4294966768 }
  0x3f   :  { %963 = dma.done.wait [#allocation21], 128  }
  0x40   :  { %964 = vsyncadd [#allocation21], 4294967168  ;;  %v238_v0 = vld [vmem:[#allocation2 + $0x18] sm:$0xff]  ;;  %v237_v1 = vld [vmem:[#allocation2 + $0x10] sm:$0xff]  ;;  %s1203_s3 = sld [smem:[#allocation34_spill]]  ;;  %vm243_vm0 = vcmask 261120  }
  0x41   :  { %259 = vmatpush.msra.mxu0 %v238_v0  ;;  %v271_v2 = vld [vmem:[#allocation7 + $0x18] sm:$0xff]  ;;  %v236_v3 = vld [vmem:[#allocation2 + $0x8] sm:$0xff]  ;;  %v270_v6 = vld [vmem:[#allocation7 + $0x10] sm:$0xff]  ;;  %s983_s23 = smov 112   ;;  %s984_s26 = smov 96   ;;  %vm353_vm1 = vcmask 130048  }
  0x42   :  { %291 = vmatpush.msra.mxu1 %v271_v2  ;;  %v235_v4 = vld [vmem:[#allocation2] sm:$0xff]  ;;  %v269_v7 = vld [vmem:[#allocation7 + $0x8] sm:$0xff]  ;;  %v302_v14 = vld [vmem:[#allocation10 + $0x10] sm:$0xff]  ;;  %vm518_vm6 = vcmask 31744   ;;  %s549_s6 = sshll.u32 %s1194_s18, 4  ;;  %s987_s25 = smov [#allocation22]   ;;  %s550_s6 = int_to_ptr.hbm [resolvable:$true] %s549_s6 }
  0x43   :  { %260 = vmatpush.msra.mxu0 %v237_v1  ;;  %v268_v8 = vld [vmem:[#allocation7] sm:$0xff]  ;;  %v600_v10 = vld [vmem:[#allocation5] ss:$0 sm:$0xff]  ;;  %v301_v15 = vld [vmem:[#allocation10 + $0x8] sm:$0xff]  ;;  %s536_s21 = sshll.u32 %s987_s25, 4  ;;  %s538_s24 = sshll.u32 %s1193_s17, 4  ;;  %s537_s21 = int_to_ptr.vmem [resolvable:$true] %s536_s21  ;;  %s539_s24 = int_to_ptr.hbm [resolvable:$true] %s538_s24 }
  0x44   :  { %292 = vmatpush.msra.mxu1 %v270_v6  ;;  %v303_v9 = vld [vmem:[#allocation10 + $0x18] sm:$0xff]  ;;  %v300_v16 = vld [vmem:[#allocation10] sm:$0xff]  ;;  %v332_v31 = vld [vmem:[#allocation20] sm:$0xff]  ;;  %vm459_vm7 = vcmask 392192  }
  0x45   :  { %261 = vmatpush.msra.mxu0 %v236_v3  ;;  %323 = vmatpush.msra.mxu2 %v303_v9  ;;  %v601_v17 = vld [vmem:[#allocation8] ss:$0 sm:$0xff]  ;;  %v602_v21 = vld [vmem:[#allocation11] ss:$0 sm:$0xff]  ;;  %v348_v25 = vld [vmem:[%s1183_s7 + $0x8] sm:$0xff] }
  0x46   :  { %v234_v5 = vld [vmem:[%s1203_s3] sm:$0xff]  ;;  %293 = vmatpush.msra.mxu1 %v269_v7  ;;  %v462_v26 = vld [vmem:[%s1189_s13 + $0x8] sm:$0xff]  ;;  %371 = vmatpush.msra.mxu3 %v348_v25  ;;  %v380_v45 = vld [vmem:[#allocation14 + $0x10] sm:$0xff] }
  0x47   :  { %262 = vmatpush.msra.mxu0 %v235_v4  ;;  %324 = vmatpush.msra.mxu2 %v302_v14  ;;  %v347_v27 = vld [vmem:[%s1183_s7] sm:$0xff]  ;;  %s985_s7 = smov 16   ;;  %v379_v46 = vld [vmem:[#allocation14 + $0x8] sm:$0xff]  ;;  %v378_v47 = vld [vmem:[#allocation14] sm:$0xff] }
  0x48   :  { %574 = vmatmul.msk.f32.vlgmr.msra.gmra.mxu0 %vm243_vm0, %v234_v5  ;;  %294 = vmatpush.msra.mxu1 %v268_v8  ;;  %v461_v28 = vld [vmem:[%s1189_s13] sm:$0xff]  ;;  %v411_v14 = vld [vmem:[#allocation17 + $0x8] sm:$0xff] }
  0x49   :  { %325 = vmatpush.msra.mxu2 %v301_v15  ;;  %372 = vmatpush.msra.mxu3 %v347_v27  ;;  %v331_v30 = vld [vmem:[%s1191_s15] sm:$0xff]  ;;  %v410_v15 = vld [vmem:[#allocation17] sm:$0xff] }
  0x4a   :  { %481 = vmatpush.msrb.mxu1 %v462_v26  ;;  %v339_v33 = vmul.f32 %v332_v31, %v331_v30  ;;  %v381_v44 = vld [vmem:[#allocation14 + $0x18] sm:$0xff] }
  0x4b   :  { %326 = vmatpush.msra.mxu2 %v300_v16  ;;  %401 = vmatpush.msrb.mxu3 %v381_v44  ;;  %v603_v51 = vld [vmem:[%s1190_s14] ss:$0 sm:$0xff]  ;;  %v604_v56 = vld [vmem:[#allocation13] ss:$0 sm:$0xff]  ;;  %s986_s14 = smov [#allocation23]  }
  0x4c   :  { %482 = vmatpush.msrb.mxu1 %v461_v28  ;;  %s547_s22 = sshll.u32 %s986_s14, 4  ;;  %s548_s22 = int_to_ptr.vmem [resolvable:$true] %s547_s22 }
  0x4d   :  { %402 = vmatpush.msrb.mxu3 %v380_v45 }
  0x4f   :  { %403 = vmatpush.msrb.mxu3 %v379_v46 }
  0x51   :  { %404 = vmatpush.msrb.mxu3 %v378_v47 }
  0xc5   :  { %v264_v11 = vpop.f32.mrf.mxu0 }
  0xc6   :  { %v265_v12 = vadd.f32 %v600_v10, %v264_v11 }
  0xc8   :  { %v267_v13 = vmax.f32 %v265_v12, 0.0  ;;  %v413_v12 = vld [vmem:[#allocation17 + $0x18] sm:$0xff] }
  0xc9   :  { %433 = vmatpush.msrb.mxu0 %v413_v12 }
  0xca   :  { %575 = vmatmul.msk.f32.vlgmr.msra.gmra.mxu1 %vm243_vm0, %v267_v13  ;;  %v412_v13 = vld [vmem:[#allocation17 + $0x10] sm:$0xff] }
  0xcb   :  { %434 = vmatpush.msrb.mxu0 %v412_v13 }
  0xcd   :  { %435 = vmatpush.msrb.mxu0 %v411_v14 }
  0xcf   :  { %436 = vmatpush.msrb.mxu0 %v410_v15 }
 0x147   :  { %v296_v18 = vpop.f32.mrf.mxu1 }
 0x148   :  { %v297_v19 = vadd.f32 %v601_v17, %v296_v18 }
 0x14a   :  { %v299_v20 = vmax.f32 %v297_v19, 0.0  ;;  %v605_v19 = vld [vmem:[#allocation16] ss:$0 sm:$0xff] }
 0x14c   :  { %576 = vmatmul.msk.f32.vlgmr.msra.gmra.mxu2 %vm243_vm0, %v299_v20 }
 0x1cf   :  { %v328_v22 = vpop.f32.mrf.mxu2 }
 0x1d0   :  { %v329_v23 = vadd.f32 %v602_v21, %v328_v22 }
 0x1d2   :  { %334 = vrot.lane.b32.xlu0 %v329_v23, %s983_s23  ;;  %v1130_v24 = vmul.f32 %v329_v23, %v329_v23 }
 0x1d4   :  { %v443_v26 = vadd.f32 1e-08, %v1130_v24 }
 0x1da   :  { %340 = vrot.lane.b32.xlu0 %v329_v23, %s984_s26 }
 0x1e2   :  { %447 = vrot.lane.b32.xlu0 %v1130_v24, %s983_s23 }
 0x244   :  { %v335_v29 = vpop.permute.xlu0 %334 }
 0x245   :  { %v337_v32 = vmul.f32 %v335_v29, %v331_v30 }
 0x247   :  { %v338_v35 = vadd.f32 %v337_v32, %v329_v23 }
 0x24c   :  { %v341_v34 = vpop.permute.xlu0 %340 }
 0x24d   :  { %v343_v36 = vmul.f32 %v341_v34, %v339_v33  ;;  %v345_v37 = vmul.f32 %v341_v34, %v331_v30 }
 0x24f   :  { %v344_v38 = vadd.f32 %v343_v36, %v338_v35  ;;  %v346_v39 = vadd.f32 %v345_v37, %v335_v29  ;;  %v606_v35 = vld [vmem:[#allocation19] ss:$0 sm:$0xff] }
 0x251   :  { %577 = vmatmul.msk.f32.vlgmr.msra.gmra.mxu3 %vm353_vm1, %v344_v38  ;;  %580 = vmatmul.msk.f32.vlgmr.msrb.gmra.mxu1 %vm353_vm1, %v344_v38  ;;  %v495_v40 = vmul.f32 %v346_v39, %v346_v39  ;;  %v463_v42 = vmul.f32 %v344_v38, %v344_v38 }
 0x253   :  { %v496_v41 = vsel %vm353_vm1, %v495_v40, 0.0  ;;  %v464_v43 = vsel %vm353_vm1, %v463_v42, 0.0 }
 0x254   :  { %497 = vadd.xlane.f32.xlu1 %v496_v41  ;;  %v448_v32 = vpop.permute.xlu0 %447 }
 0x25c   :  { %465 = vadd.xlane.f32.xlu1 %v464_v43 }
 0x275   :  { %450 = vrot.lane.b32.xlu1 %v1130_v24, %s985_s7 }
 0x2c7   :  { %v498_v48 = vpop.xlane.xlu1 %497 }
 0x2c8   :  { %v501_v49 = vmul.f32 2.0, %v498_v48 }
 0x2ca   :  { %v502_v50 = vadd.f32 1.0, %v501_v49 }
 0x2cc   :  { %607 = vrcp.f32 %v502_v50  ;;  %v512_v0 = vand.u32 2147483647, %v502_v50  ;;  %v514_v1 = vand.u32 2147483648, %v502_v50  ;;  %vm508_vm3 = vweird.f32 %v502_v50 }
 0x2ce   :  { %v484_v52 = vpop.f32.mrf.mxu1  ;;  %v515_v6 = vor.u32 1.1754944e-38, %v514_v1  ;;  %vm513_vm5 = vcmp.eq.f32.partialorder %v512_v0, 8.507059e+37 }
 0x2cf   :  { %v492_v53 = vmul.f32 2.0, %v484_v52  ;;  %v466_v54 = vpop.xlane.xlu1 %465 }
 0x2d0   :  { %v491_v55 = vadd.f32 %v603_v51, %v466_v54 }
 0x2d2   :  { %v608_v57 = vpop.eup %607  ;;  %v493_v58 = vsub.f32 %v491_v55, %v492_v53 }
 0x2d3   :  { %v504_v59 = vmul.f32 %v608_v57, %v502_v50  ;;  %vm509_vm2 = vweird.f32 %v608_v57 }
 0x2d4   :  { %v494_v60 = vmax.f32 %v493_v58, 0.0  ;;  %v374_v61 = vpop.f32.mrf.mxu3  ;;  %vm510_vm4 = vmor %vm508_vm3, %vm509_vm2 }
 0x2d5   :  { %v375_v62 = vadd.f32 %v604_v56, %v374_v61  ;;  %v505_v63 = vsub.f32 1.0, %v504_v59 }
 0x2d6   :  { %v499_v2 = vadd.f32 1.0, %v494_v60 }
 0x2d7   :  { %v377_v3 = vmax.f32 %v375_v62, 0.0  ;;  %v506_v4 = vmul.f32 %v608_v57, %v505_v63 }
 0x2d8   :  { %v500_v7 = vsub.f32 0.0, %v499_v2 }
 0x2d9   :  { %578 = vmatmul.msk.f32.vlgmr.msrb.gmra.mxu3 %vm243_vm0, %v377_v3  ;;  %v507_v5 = vadd.f32 %v608_v57, %v506_v4 }
 0x2db   :  { %v511_v8 = vsel %vm510_vm4, %v608_v57, %v507_v5 }
 0x2dc   :  { %v516_v9 = vsel %vm513_vm5, %v515_v6, %v511_v8 }
 0x2dd   :  { %v517_v10 = vmul.f32 %v516_v9, %v500_v7 }
 0x2df   :  { %v519_v11 = vsel %vm518_vm6, %v517_v10, -inf }
 0x2e0   :  { %520 = vmax.xlane.f32.xlu2 %v519_v11 }
 0x2e7   :  { %v451_v30 = vpop.permute.xlu1 %450 }
 0x2e8   :  { %v457_v33 = vsel %vm353_vm1, %v448_v32, %v451_v30 }
 0x353   :  { %v521_v16 = vpop.xlane.xlu2 %520 }
 0x354   :  { %v522_v17 = vsub.f32 %v517_v10, %v521_v16 }
 0x356   :  { %v523_v18 = vmul.f32 1.442695, %v522_v17 }
 0x358   :  { %609 = vpow2.f32 %v523_v18 }
 0x359   :  { %611 = vlog2.f32 %v443_v26 }
 0x35c   :  { %v406_v20 = vpop.f32.mrf.mxu3 }
 0x35d   :  { %v407_v21 = vadd.f32 %v605_v19, %v406_v20 }
 0x35e   :  { %v610_v22 = vpop.eup %609 }
 0x35f   :  { %v409_v23 = vmax.f32 %v407_v21, 0.0  ;;  %v525_v25 = vsel %vm518_vm6, %v610_v22, 0.0  ;;  %v612_v27 = vpop.eup %611 }
 0x360   :  { %526 = vadd.xlane.f32.xlu2 %v525_v25  ;;  %v445_v28 = vmul.f32 0.6931472, %v612_v27 }
 0x361   :  { %579 = vmatmul.msk.f32.vlgmr.msrb.gmra.mxu0 %vm243_vm0, %v409_v23 }
 0x378   :  { %454 = vrot.lane.b32.xlu2 %v445_v28, %s985_s7 }
 0x3d3   :  { %v527_v29 = vpop.xlane.xlu2 %526 }
 0x3d4   :  { %613 = vrcp.f32 %v527_v29 }
 0x3da   :  { %v614_v31 = vpop.eup %613 }
 0x3db   :  { %v529_v34 = vmul.f32 %v614_v31, %v610_v22  ;;  %v455_v24 = vpop.permute.xlu2 %454 }
 0x3dc   :  { %v458_v36 = vsel %vm243_vm0, %v457_v33, %v455_v24 }
 0x3dd   :  { %530 = vst.msk [vmem:[%s1195_s19] sm:$0xff] %vm518_vm6, %v529_v34 }
 0x3de   :  { %v438_v37 = vpop.f32.mrf.mxu0  ;;  %460 = vst.msk [vmem:[#allocation23] sm:$0xff] %vm459_vm7, %v458_v36 }
 0x3df   :  { %v439_v38 = vadd.f32 %v606_v35, %v438_v37  ;;  %552 = dma.vmem_to_hbm [thread:$0]  %s548_s22, 128, %s550_s6, [#allocation24]  }
 0x3e1   :  { %441 = vst.msk [vmem:[#allocation22] sm:$0xff] %vm243_vm0, %v439_v38 }
 0x3e2   :  { %541 = dma.vmem_to_hbm [thread:$0]  %s537_s21, 128, %s539_s24, [#allocation4]  }
 0x3e3   :  { %965 = dma.done.wait [#allocation4], 128  }
 0x3e4   :  { %966 = vsyncadd [#allocation4], 4294967168 }
 0x3e5   :  { %967 = dma.done.wait [#allocation24], 128  }
 0x3e6   :  { %968 = vsyncadd [#allocation24], 4294967168 }
 0x3e7   :  { %565 = vsyncpa [#allocation3], 1 }
 0x3e8   :  { %566 = vsyncpa [#allocation6], 1 }
 0x3e9   :  { %567 = vsyncpa [#allocation9], 1 }
 0x3ea   :  { %568 = vsyncpa [#allocation12], 1 }
 0x3eb   :  { %569 = vsyncpa [#allocation15], 1 }
 0x3ec   :  { %570 = vsyncpa [#allocation18], 1 }
 0x3ed   :  { %571 = vsyncpa [#allocation21], 1 }
 0x3ee   :  { %572 = vsyncpa [#allocation4], 1 }
 0x3ef   :  { %573 = vsyncpa [#allocation24], 1 }

</bundles_post_ra>
